<compile_context>
chip_gen: v5e
topology: v5e:2x2
jax: 0.10.0
libtpu: 0.0.40
codegen_flags: <defaults>
</compile_context>

<pallas_src>
import functools

import jax
import jax.numpy as jnp
from jax import lax
from jax.experimental import pallas as pl
from jax.experimental.pallas import tpu as pltpu

WIN_SIZE = 7
K1 = 0.01
K2 = 0.03


def _round_up(n, m):
    return ((n + m - 1) // m) * m


def _ssim_kernel(x_ref, y_ref, dr_ref, o_ref, acc_ref, *,
                 k1, k2, win, th, kh, halo, band, W, Ho, Wo, hp, mxu_dtype):
    # x_ref, y_ref : (1, th, W) input strips (H is processed strip-by-strip)
    # dr_ref       : (B,) data_range in SMEM
    # o_ref        : (1, 1, 1, Wo)
    # acc_ref      : (hp, 5*W) f32 scratch holding row-box sums of the five
    #                maps [x, y, x*x, y*y, x*y], lane-concatenated.
    b = pl.program_id(0)
    t = pl.program_id(1)

    # ---- per-strip: element-wise maps in f32, MXU operands in bf16 ---------
    x = x_ref[0].astype(jnp.float32)                       # (th, W)
    y = y_ref[0].astype(jnp.float32)
    maps = jnp.concatenate(
        [x.astype(mxu_dtype), y.astype(mxu_dtype),
         (x * x).astype(mxu_dtype), (y * y).astype(mxu_dtype),
         (x * y).astype(mxu_dtype)], axis=-1)              # (th, 5W)

    # Band of the row box-sum matrix for this strip (0/1, exact in bf16).
    # Band row i corresponds to output row r0 + i.
    if kh == 1:
        r0 = 0
    else:
        r0 = pl.multiple_of(jnp.maximum(t * th - halo, 0), 8)
    row_o = lax.broadcasted_iota(jnp.int32, (band, th), 0) + r0     # out row
    row_h = lax.broadcasted_iota(jnp.int32, (band, th), 1) + t * th  # in row
    r_band = ((row_o <= row_h) & (row_h < row_o + win) & (row_o < Ho)
              ).astype(mxu_dtype)                          # (band, th)

    # One MXU push per strip: partial row sums of all five maps.
    partial = jnp.dot(r_band, maps,
                      preferred_element_type=jnp.float32)  # (band, 5W) f32

    if kh == 1:
        acc_ref[...] = partial
    else:
        @pl.when(t == 0)
        def _store_first():
            acc_ref[pl.ds(0, band), :] = partial

        @pl.when(t > 0)
        def _store_rest():
            # Halo rows shared with the previous strip: accumulate.
            acc_ref[pl.ds(r0, halo), :] += partial[:halo, :]
            # Rows owned by this strip: direct store (no zero-init / RMW).
            acc_ref[pl.ds(pl.multiple_of(r0 + halo, 8), th), :] = partial[halo:, :]

    # ---- finalize (last strip): column box filter on MXU + SSIM math -------
    @pl.when(t == kh - 1)
    def _finalize():
        inv_np = 1.0 / (win * win)
        cov_norm = (win * win) / (win * win - 1.0)

        # Banded column box-sum matrix (W, Wo), generated in-kernel.
        col_w = lax.broadcasted_iota(jnp.int32, (W, Wo), 0)
        col_o = lax.broadcasted_iota(jnp.int32, (W, Wo), 1)
        c_mat = ((col_o <= col_w) & (col_w < col_o + win)).astype(mxu_dtype)

        a = acc_ref[...].astype(mxu_dtype)                 # (hp, 5W)

        def box(m):
            rs = a[:, m * W:(m + 1) * W]                   # (hp, W)
            u = jnp.dot(rs, c_mat, preferred_element_type=jnp.float32)
            return u * inv_np                              # (hp, Wo) f32

        ux, uy, uxx, uyy, uxy = box(0), box(1), box(2), box(3), box(4)

        dr = dr_ref[b]                                     # f32 scalar (SMEM)
        c1 = (k1 * dr) ** 2
        c2 = (k2 * dr) ** 2

        vx = cov_norm * (uxx - ux * ux)
        vy = cov_norm * (uyy - uy * uy)
        vxy = cov_norm * (uxy - ux * uy)

        a1 = 2.0 * ux * uy + c1
        a2 = 2.0 * vxy + c2
        b1 = ux * ux + uy * uy + c1
        b2 = vx + vy + c2

        # Exact divide (runs once per image; negligible cost).
        s = (a1 * a2) / (b1 * b2)                          # (hp, Wo)

        # torch.mean(S, [1, 2], keepdim=True): mean over channel(=1) and Ho.
        row_id = lax.broadcasted_iota(jnp.int32, (hp, Wo), 0)
        s = jnp.where(row_id < Ho, s, 0.0)
        mean = jnp.sum(s, axis=0, keepdims=True) * (1.0 / Ho)   # (1, Wo)
        o_ref[...] = mean.reshape(1, 1, 1, Wo).astype(o_ref.dtype)


def ssim_cal_pallas(X, Y, data_range, win_size=WIN_SIZE, k1=K1, k2=K2,
                    mxu_dtype=jnp.bfloat16):
    B, H, W = X.shape
    Ho = H - win_size + 1
    Wo = W - win_size + 1
    assert Ho > 0 and Wo > 0

    # Strip size along H.  (Larger strips amortize per-step overhead; the
    # band-limited row matmul keeps MXU work ~O(H*TH*W).)
    TH = H
    if H > 512:
        for cand in (512, 256, 128):
            if H % cand == 0:
                TH = cand
                break
    KH = H // TH

    halo = _round_up(win_size - 1, 8)          # halo rows shared by strips
    if KH == 1:
        band = _round_up(Ho, 8)
        Hp = band
    else:
        band = TH + halo
        Hp = H                                  # = KH*TH, multiple of 8

    dr = data_range.reshape(B).astype(jnp.float32)

    # VMEM budget from the (padded) tile footprint; cap below v7x's 64 MiB/TC.
    in_b = X.dtype.itemsize
    lp = lambda n: _round_up(n, 128)
    strip_buf = _round_up(TH, 8) * lp(W) * in_b
    acc_b = Hp * lp(5 * W) * 4
    partial_b = _round_up(band, 8) * lp(5 * W) * 4
    maps_b = _round_up(TH, 8) * lp(5 * W) * 2
    rband_b = _round_up(band, 8) * lp(TH) * 2
    fin_b = (Hp * lp(5 * W) * 2                # bf16 copy of the accumulator
             + 8 * Hp * lp(Wo) * 4             # u maps + SSIM temporaries
             + _round_up(W, 8) * lp(Wo) * 2)   # column band matrix
    out_b = 8 * lp(Wo) * 4
    est = (2 * 2 * strip_buf + acc_b + partial_b + maps_b + rband_b
           + fin_b + 2 * out_b)
    vmem_limit = int(min(56 * 2**20, max(32 * 2**20, int(1.25 * est))))

    kernel = functools.partial(
        _ssim_kernel, k1=float(k1), k2=float(k2), win=win_size, th=TH, kh=KH,
        halo=halo, band=band, W=W, Ho=Ho, Wo=Wo, hp=Hp, mxu_dtype=mxu_dtype)

    return pl.pallas_call(
        kernel,
        out_shape=jax.ShapeDtypeStruct((B, 1, 1, Wo), jnp.float32),
        grid=(B, KH),
        in_specs=[
            pl.BlockSpec((1, TH, W), lambda b, t: (b, t, 0)),   # X strip
            pl.BlockSpec((1, TH, W), lambda b, t: (b, t, 0)),   # Y strip
            pl.BlockSpec(memory_space=pltpu.MemorySpace.SMEM),  # data_range
        ],
        out_specs=pl.BlockSpec((1, 1, 1, Wo), lambda b, t: (b, 0, 0, 0)),
        scratch_shapes=[pltpu.VMEM((Hp, 5 * W), jnp.float32)],
        compiler_params=pltpu.CompilerParams(
            dimension_semantics=("parallel", "arbitrary"),
            vmem_limit_bytes=vmem_limit),
    )(X, Y, dr)


def ssim_cal_ref(X, Y, data_range, win_size=WIN_SIZE, k1=K1, k2=K2):
    # Plain-JAX f32 reference mirroring the PyTorch forward.
    w = jnp.ones((1, 1, win_size, win_size), jnp.float32) / (win_size ** 2)
    NP = win_size ** 2
    cov_norm = NP / (NP - 1)
    Xc = X[:, None].astype(jnp.float32)
    Yc = Y[:, None].astype(jnp.float32)
    dr = data_range[:, None, None, None].astype(jnp.float32)
    conv = lambda a: lax.conv_general_dilated(a, w, (1, 1), "VALID")
    ux, uy = conv(Xc), conv(Yc)
    uxx, uyy, uxy = conv(Xc * Xc), conv(Yc * Yc), conv(Xc * Yc)
    C1 = (k1 * dr) ** 2
    C2 = (k2 * dr) ** 2
    vx = cov_norm * (uxx - ux * ux)
    vy = cov_norm * (uyy - uy * uy)
    vxy = cov_norm * (uxy - ux * uy)
    A1, A2 = 2 * ux * uy + C1, 2 * vxy + C2
    B1, B2 = ux ** 2 + uy ** 2 + C1, vx + vy + C2
    S = A1 * A2 / (B1 * B2)
    return jnp.mean(S, axis=(1, 2), keepdims=True)


if __name__ == "__main__":
    key = jax.random.PRNGKey(0)
    kx, ky, kd = jax.random.split(key, 3)

    B, H, W = 2, 16, 16
    X = jax.random.uniform(kx, (B, H, W), dtype=jnp.float32)
    Y = jax.random.uniform(ky, (B, H, W), dtype=jnp.float32)
    data_range = 1.0 + jax.random.uniform(kd, (B,), dtype=jnp.float32)

    ref = jax.block_until_ready(ssim_cal_ref(X, Y, data_range))

    # 1) Structural check: f32 MXU operands must match the reference tightly.
    out_f32 = jax.block_until_ready(
        ssim_cal_pallas(X, Y, data_range, mxu_dtype=jnp.float32))
    assert out_f32.shape == (B, 1, 1, W - WIN_SIZE + 1), out_f32.shape
    assert jnp.allclose(out_f32, ref, rtol=1e-4, atol=1e-5), (out_f32, ref)

    # 2) Default (bf16 MXU) path: bf16 rounding of the window moments is
    #    amplified by the (uxy - ux*uy) cancellation in the SSIM numerator,
    #    so compare with a tolerance sized for bf16 matmuls.
    out = jax.block_until_ready(ssim_cal_pallas(X, Y, data_range))
    assert out.shape == (B, 1, 1, W - WIN_SIZE + 1), out.shape
    assert jnp.allclose(out, ref, rtol=5e-2, atol=2e-2), (
        float(jnp.max(jnp.abs(out - ref))), out, ref)

    print("KERNEL_OK")
</pallas_src>

<mosaic_0001>
module attributes {stable_mosaic.version = 11 : i64} {
  func.func @_ssim_kernel(%arg0: i32, %arg1: i32, %arg2: memref<1x16x16xf32, #tpu.memory_space<vmem>>, %arg3: memref<1x16x16xf32, #tpu.memory_space<vmem>>, %arg4: memref<2xf32, #tpu.memory_space<smem>>, %arg5: memref<1x1x1x10xf32, #tpu.memory_space<vmem>>, %arg6: memref<16x80xf32, #tpu.memory_space<vmem>>) attributes {dimension_semantics = [#tpu.dimension_semantics<parallel>, #tpu.dimension_semantics<arbitrary>], iteration_bounds = array<i64: 2, 1>, scalar_prefetch = 0 : i64, scratch_operands = 1 : i64, tpu.core_type = #tpu.core_type<tc>, window_params = [{transform_indices = @transform_0, window_bounds = array<i64: 1, 16, 16>}, {transform_indices = @transform_1, window_bounds = array<i64: 1, 16, 16>}, {transform_indices = @transform_2, window_bounds = array<i64: 2>}, {transform_indices = @transform_3, window_bounds = array<i64: 1, 1, 1, 10>}]} {
    %c0 = arith.constant 0 : index
    %c0_0 = arith.constant 0 : index
    %c0_1 = arith.constant 0 : index
    %0 = vector.load %arg2[%c0, %c0_0, %c0_1] : memref<1x16x16xf32, #tpu.memory_space<vmem>>, vector<1x16x16xf32>
    %1 = vector.shape_cast %0 : vector<1x16x16xf32> to vector<16x16xf32>
    %c0_2 = arith.constant 0 : index
    %c0_3 = arith.constant 0 : index
    %c0_4 = arith.constant 0 : index
    %2 = vector.load %arg3[%c0_2, %c0_3, %c0_4] : memref<1x16x16xf32, #tpu.memory_space<vmem>>, vector<1x16x16xf32>
    %3 = vector.shape_cast %2 : vector<1x16x16xf32> to vector<16x16xf32>
    %4 = arith.mulf %1, %1 : vector<16x16xf32>
    %5 = arith.mulf %3, %3 : vector<16x16xf32>
    %6 = arith.mulf %1, %3 : vector<16x16xf32>
    %7 = tpu.concatenate %1, %3, %4, %5, %6 in 1 : vector<16x16xf32>, vector<16x16xf32>, vector<16x16xf32>, vector<16x16xf32>, vector<16x16xf32> -> vector<16x80xf32>
    %8 = tpu.iota {dimensions = array<i32: 0>} : vector<16x16xi32>
    %c0_i32 = arith.constant 0 : i32
    %9 = vector.broadcast %c0_i32 : i32 to vector<16x16xi32>
    %10 = arith.addi %8, %9 : vector<16x16xi32>
    %11 = tpu.iota {dimensions = array<i32: 1>} : vector<16x16xi32>
    %c16_i32 = arith.constant 16 : i32
    %12 = arith.muli %arg1, %c16_i32 : i32
    %13 = vector.broadcast %12 : i32 to vector<16x16xi32>
    %14 = arith.addi %11, %13 : vector<16x16xi32>
    %15 = arith.cmpi sle, %10, %14 : vector<16x16xi32>
    %c7_i32 = arith.constant 7 : i32
    %16 = vector.broadcast %c7_i32 : i32 to vector<16x16xi32>
    %17 = arith.addi %10, %16 : vector<16x16xi32>
    %18 = arith.cmpi slt, %14, %17 : vector<16x16xi32>
    %19 = arith.andi %15, %18 : vector<16x16xi1>
    %c10_i32 = arith.constant 10 : i32
    %20 = vector.broadcast %c10_i32 : i32 to vector<16x16xi32>
    %21 = arith.cmpi slt, %10, %20 : vector<16x16xi32>
    %22 = arith.andi %19, %21 : vector<16x16xi1>
    %23 = arith.extui %22 : vector<16x16xi1> to vector<16x16xi32>
    %24 = arith.sitofp %23 : vector<16x16xi32> to vector<16x16xf32>
    %cst = arith.constant dense<0.000000e+00> : vector<16x80xf32>
    %25 = tpu.matmul %24, %7, %cst {dimension_numbers = #tpu.dot_dimension_numbers<[1], [0], [0], [1], [0, 0, 1, 1], [], []>} : vector<16x16xf32>, vector<16x80xf32>, vector<16x80xf32> -> vector<16x80xf32>
    %c0_5 = arith.constant 0 : index
    %c0_6 = arith.constant 0 : index
    %26 = vector.load %arg6[%c0_5, %c0_6] : memref<16x80xf32, #tpu.memory_space<vmem>>, vector<16x80xf32>
    tpu.vector_store %arg6[%c0_5, %c0_6], %25 {strides = array<i32>} : memref<16x80xf32, #tpu.memory_space<vmem>>, vector<16x80xf32>,
    %c0_i32_7 = arith.constant 0 : i32
    %27 = arith.cmpi eq, %arg1, %c0_i32_7 : i32
    %28 = arith.extui %27 : i1 to i32
    %c0_i32_8 = arith.constant 0 : i32
    %29 = arith.cmpi ne, %28, %c0_i32_8 : i32
    scf.if %29 {
      %30 = tpu.iota {dimensions = array<i32: 0>} : vector<16x10xi32>
      %31 = tpu.iota {dimensions = array<i32: 1>} : vector<16x10xi32>
      %32 = arith.cmpi sle, %31, %30 : vector<16x10xi32>
      %c7_i32_9 = arith.constant 7 : i32
      %33 = vector.broadcast %c7_i32_9 : i32 to vector<16x10xi32>
      %34 = arith.addi %31, %33 : vector<16x10xi32>
      %35 = arith.cmpi slt, %30, %34 : vector<16x10xi32>
      %36 = arith.andi %32, %35 : vector<16x10xi1>
      %37 = arith.extui %36 : vector<16x10xi1> to vector<16x10xi32>
      %38 = arith.sitofp %37 : vector<16x10xi32> to vector<16x10xf32>
      %c0_10 = arith.constant 0 : index
      %c0_11 = arith.constant 0 : index
      %39 = vector.load %arg6[%c0_10, %c0_11] : memref<16x80xf32, #tpu.memory_space<vmem>>, vector<16x80xf32>
      %40 = vector.extract_strided_slice %39 {offsets = [0, 0], sizes = [16, 16], strides = [1, 1]} : vector<16x80xf32> to vector<16x16xf32>
      %cst_12 = arith.constant dense<0.000000e+00> : vector<16x10xf32>
      %41 = tpu.matmul %40, %38, %cst_12 {dimension_numbers = #tpu.dot_dimension_numbers<[1], [0], [0], [1], [0, 0, 1, 1], [], []>} : vector<16x16xf32>, vector<16x10xf32>, vector<16x10xf32> -> vector<16x10xf32>
      %cst_13 = arith.constant 0.0204081628 : f32
      %42 = vector.broadcast %cst_13 : f32 to vector<16x10xf32>
      %43 = arith.mulf %41, %42 : vector<16x10xf32>
      %44 = vector.extract_strided_slice %39 {offsets = [0, 16], sizes = [16, 16], strides = [1, 1]} : vector<16x80xf32> to vector<16x16xf32>
      %cst_14 = arith.constant dense<0.000000e+00> : vector<16x10xf32>
      %45 = tpu.matmul %44, %38, %cst_14 {dimension_numbers = #tpu.dot_dimension_numbers<[1], [0], [0], [1], [0, 0, 1, 1], [], []>} : vector<16x16xf32>, vector<16x10xf32>, vector<16x10xf32> -> vector<16x10xf32>
      %cst_15 = arith.constant 0.0204081628 : f32
      %46 = vector.broadcast %cst_15 : f32 to vector<16x10xf32>
      %47 = arith.mulf %45, %46 : vector<16x10xf32>
      %48 = vector.extract_strided_slice %39 {offsets = [0, 32], sizes = [16, 16], strides = [1, 1]} : vector<16x80xf32> to vector<16x16xf32>
      %cst_16 = arith.constant dense<0.000000e+00> : vector<16x10xf32>
      %49 = tpu.matmul %48, %38, %cst_16 {dimension_numbers = #tpu.dot_dimension_numbers<[1], [0], [0], [1], [0, 0, 1, 1], [], []>} : vector<16x16xf32>, vector<16x10xf32>, vector<16x10xf32> -> vector<16x10xf32>
      %cst_17 = arith.constant 0.0204081628 : f32
      %50 = vector.broadcast %cst_17 : f32 to vector<16x10xf32>
      %51 = arith.mulf %49, %50 : vector<16x10xf32>
      %52 = vector.extract_strided_slice %39 {offsets = [0, 48], sizes = [16, 16], strides = [1, 1]} : vector<16x80xf32> to vector<16x16xf32>
      %cst_18 = arith.constant dense<0.000000e+00> : vector<16x10xf32>
      %53 = tpu.matmul %52, %38, %cst_18 {dimension_numbers = #tpu.dot_dimension_numbers<[1], [0], [0], [1], [0, 0, 1, 1], [], []>} : vector<16x16xf32>, vector<16x10xf32>, vector<16x10xf32> -> vector<16x10xf32>
      %cst_19 = arith.constant 0.0204081628 : f32
      %54 = vector.broadcast %cst_19 : f32 to vector<16x10xf32>
      %55 = arith.mulf %53, %54 : vector<16x10xf32>
      %56 = vector.extract_strided_slice %39 {offsets = [0, 64], sizes = [16, 16], strides = [1, 1]} : vector<16x80xf32> to vector<16x16xf32>
      %cst_20 = arith.constant dense<0.000000e+00> : vector<16x10xf32>
      %57 = tpu.matmul %56, %38, %cst_20 {dimension_numbers = #tpu.dot_dimension_numbers<[1], [0], [0], [1], [0, 0, 1, 1], [], []>} : vector<16x16xf32>, vector<16x10xf32>, vector<16x10xf32> -> vector<16x10xf32>
      %cst_21 = arith.constant 0.0204081628 : f32
      %58 = vector.broadcast %cst_21 : f32 to vector<16x10xf32>
      %59 = arith.mulf %57, %58 : vector<16x10xf32>
      %60 = arith.index_cast %arg0 : i32 to index
      %61 = memref.load %arg4[%60] : memref<2xf32, #tpu.memory_space<smem>>
      %cst_22 = arith.constant 0.00999999977 : f32
      %62 = arith.mulf %cst_22, %61 : f32
      %63 = arith.mulf %62, %62 : f32
      %cst_23 = arith.constant 3.000000e-02 : f32
      %64 = arith.mulf %cst_23, %61 : f32
      %65 = arith.mulf %64, %64 : f32
      %66 = arith.mulf %43, %43 : vector<16x10xf32>
      %67 = arith.subf %51, %66 : vector<16x10xf32>
      %cst_24 = arith.constant 1.02083337 : f32
      %68 = vector.broadcast %cst_24 : f32 to vector<16x10xf32>
      %69 = arith.mulf %68, %67 : vector<16x10xf32>
      %70 = arith.mulf %47, %47 : vector<16x10xf32>
      %71 = arith.subf %55, %70 : vector<16x10xf32>
      %cst_25 = arith.constant 1.02083337 : f32
      %72 = vector.broadcast %cst_25 : f32 to vector<16x10xf32>
      %73 = arith.mulf %72, %71 : vector<16x10xf32>
      %74 = arith.mulf %43, %47 : vector<16x10xf32>
      %75 = arith.subf %59, %74 : vector<16x10xf32>
      %cst_26 = arith.constant 1.02083337 : f32
      %76 = vector.broadcast %cst_26 : f32 to vector<16x10xf32>
      %77 = arith.mulf %76, %75 : vector<16x10xf32>
      %cst_27 = arith.constant 2.000000e+00 : f32
      %78 = vector.broadcast %cst_27 : f32 to vector<16x10xf32>
      %79 = arith.mulf %78, %43 : vector<16x10xf32>
      %80 = arith.mulf %79, %47 : vector<16x10xf32>
      %81 = vector.broadcast %63 : f32 to vector<16x10xf32>
      %82 = arith.addf %80, %81 : vector<16x10xf32>
      %cst_28 = arith.constant 2.000000e+00 : f32
      %83 = vector.broadcast %cst_28 : f32 to vector<16x10xf32>
      %84 = arith.mulf %83, %77 : vector<16x10xf32>
      %85 = vector.broadcast %65 : f32 to vector<16x10xf32>
      %86 = arith.addf %84, %85 : vector<16x10xf32>
      %87 = arith.mulf %43, %43 : vector<16x10xf32>
      %88 = arith.mulf %47, %47 : vector<16x10xf32>
      %89 = arith.addf %87, %88 : vector<16x10xf32>
      %90 = vector.broadcast %63 : f32 to vector<16x10xf32>
      %91 = arith.addf %89, %90 : vector<16x10xf32>
      %92 = arith.addf %69, %73 : vector<16x10xf32>
      %93 = vector.broadcast %65 : f32 to vector<16x10xf32>
      %94 = arith.addf %92, %93 : vector<16x10xf32>
      %95 = arith.mulf %82, %86 : vector<16x10xf32>
      %96 = arith.mulf %91, %94 : vector<16x10xf32>
      %97 = arith.divf %95, %96 : vector<16x10xf32>
      %98 = tpu.iota {dimensions = array<i32: 0>} : vector<16x10xi32>
      %c10_i32_29 = arith.constant 10 : i32
      %99 = vector.broadcast %c10_i32_29 : i32 to vector<16x10xi32>
      %100 = arith.cmpi slt, %98, %99 : vector<16x10xi32>
      %cst_30 = arith.constant 0.000000e+00 : f32
      %101 = vector.broadcast %cst_30 : f32 to vector<16x10xf32>
      %102 = arith.select %100, %97, %101 : vector<16x10xi1>, vector<16x10xf32>
      %cst_31 = arith.constant dense<0.000000e+00> : vector<10xf32>
      %103 = vector.multi_reduction <add>, %102, %cst_31 [0] : vector<16x10xf32> to vector<10xf32>
      %104 = vector.shape_cast %103 : vector<10xf32> to vector<1x10xf32>
      %cst_32 = arith.constant 1.000000e-01 : f32
      %105 = vector.broadcast %cst_32 : f32 to vector<1x10xf32>
      %106 = arith.mulf %104, %105 : vector<1x10xf32>
      %107 = vector.shape_cast %106 : vector<1x10xf32> to vector<1x1x1x10xf32>
      %c0_33 = arith.constant 0 : index
      %c0_34 = arith.constant 0 : index
      %c0_35 = arith.constant 0 : index
      %c0_36 = arith.constant 0 : index
      %108 = vector.load %arg5[%c0_33, %c0_34, %c0_35, %c0_36] : memref<1x1x1x10xf32, #tpu.memory_space<vmem>>, vector<1x1x1x10xf32>
      tpu.vector_store %arg5[%c0_33, %c0_34, %c0_35, %c0_36], %107 {strides = array<i32>} : memref<1x1x1x10xf32, #tpu.memory_space<vmem>>, vector<1x1x1x10xf32>,
    } else {
    }
    return
  }
  func.func @transform_0(%arg0: i32, %arg1: i32) -> (i32, i32, i32) {
    %c0_i32 = arith.constant 0 : i32
    %c0_i32_0 = arith.constant 0 : i32
    return %arg0, %arg1, %c0_i32 : i32, i32, i32
  }
  func.func @transform_1(%arg0: i32, %arg1: i32) -> (i32, i32, i32) {
    %c0_i32 = arith.constant 0 : i32
    %c0_i32_0 = arith.constant 0 : i32
    return %arg0, %arg1, %c0_i32 : i32, i32, i32
  }
  func.func @transform_2(%arg0: i32, %arg1: i32) -> i32 {
    %c0_i32 = arith.constant 0 : i32
    %c0_i32_0 = arith.constant 0 : i32
    return %c0_i32 : i32
  }
  func.func @transform_3(%arg0: i32, %arg1: i32) -> (i32, i32, i32, i32) {
    %c0_i32 = arith.constant 0 : i32
    %c0_i32_0 = arith.constant 0 : i32
    %c0_i32_1 = arith.constant 0 : i32
    %c0_i32_2 = arith.constant 0 : i32
    return %arg0, %c0_i32, %c0_i32_0, %c0_i32_1 : i32, i32, i32, i32
  }
}

</mosaic_0001>

<bundles_post_ra>
// kernel: tpu_custom_call.1
= control target key start
LH: loop header
LB: loop body
LE: loop exit
PB: predicated region body
PF: predicated region fallthrough
CT: control target
= control target key end

     0   :  { %s1360_s0 = inlined_call_operand.hbm [shape: f32[2,16,16], index: 0, kind: input, shape index: {}]   ;;  %s1361_s1 = inlined_call_operand.hbm [shape: f32[2,16,16], index: 1, kind: input, shape index: {}]   ;;  %s1362_s2 = inlined_call_operand.vmem [shape: f32[2], index: 2, kind: input, shape index: {}]   ;;  %s1363_s3 = inlined_call_operand.hbm [shape: f32[2,1,1,10], index: 3, kind: output, shape index: {}]  }
   0x1   :  { %1366 = sst [smem:[#allocation17_spill]] %s1360_s0 }
   0x2   :  { %1367 = sst [smem:[#allocation18_spill]] %s1362_s2 }
   0x3   :  { %8 = vsyncpa [#allocation4], 0 }
   0x4   :  { %10 = vsyncpa [#allocation4 + $0x1], 0 }
   0x5   :  { %11 = vsyncpa [#allocation8], 0 }
   0x6   :  { %13 = vsyncpa [#allocation8 + $0x1], 0 }
   0x7   :  { %14 = vsyncpa [#allocation6], 0 }
   0x8   :  { %15 = vsyncpa [#allocation5], 0 }
   0x9   :  { %17 = vsyncpa [#allocation5 + $0x1], 0  ;;  %s1139_s12 = smov 0   ;;  %s1141_s13 = smov 0  }
   0xa   :  { %s1143_s14 = smov 0   ;;  %s1145_s15 = smov 0  }
   0xb   :  { %s1147_s16 = smov 0   ;;  %s1149_s17 = smov 0  }
   0xc LB: > { %1368 = sst [smem:[#allocation15_spill]] %s1101_s16  ;;  %s778_s18 = sadd.s32 4294967295, %s1105_s17   ;;  %s1105_s17 = sphi %s1149_s17, %s23_s17   ;;  %s1101_s16 = sphi %s1147_s16, %s1382_s16   ;;  %s1097_s15 = sphi %s1145_s15, %s1381_s15   ;;  %s1093_s14 = sphi %s1143_s14, %s1385_s14   ;;  %s1089_s13 = sphi %s1141_s13, %s1384_s13   ;;  %s1085_s12 = sphi %s1139_s12, %s1383_s12  }
   0xd   : > { %s779_s19 = sadd.s32 4294967294, %s1105_s17   ;;  %s44_s20 = sadd.s32 1, %s1093_s14 }
   0xe   : > { %p51_p0 = scmp.ne.s32.totalorder %s1093_s14, %s1089_s13  ;;  %p52_p1 = scmp.eq.s32.totalorder %s1105_s17, 0 }
   0xf   : > { %p57_p2 = scmp.ne.s32.totalorder %s1089_s13, %s1085_s12  ;;  %p1177_p3 = scmp.eq.s32.totalorder %s778_s18, 0 }
  0x10   : > { %p130_p4 = scmp.eq.s32.totalorder %s778_s18, 1  ;;  %p1181_p5 = por %p52_p1, %p51_p0 }
  0x11   : > { %p136_p6 = scmp.eq.s32.totalorder %s779_s19, 1  ;;  %p1187_p7 = por %p1177_p3, %p57_p2 }
  0x12   : > { %p1191_p8 = por %p130_p4, %p51_p0  ;;  %p780_p10 = scmp.ge.s32.totalorder %s1105_s17, 1 }
  0x13   : > { %p1195_p9 = por %p136_p6, %p57_p2  ;;  %p143_p11 = scmp.lt.s32.totalorder %s1105_s17, 3 }
  0x14   : > { %s1374_s2 = sld [smem:[#allocation18_spill]]  ;;  %p782_p13 = scmp.ge.s32.totalorder %s1105_s17, 2 }
  0x15   : > { %p1204_p12 = pnand %p780_p10, %p143_p11  ;;  %p853_p0 = scmp.lt.s32.totalorder %s1105_s17, 2 }
  0x16   : > { %s35_s4 = sadd.s32 1, %s1101_s16  ;;  %s1222_s5 = sand.u32 1, %s1093_s14  }
  0x17   : > { %p837_p1 = pneg %p1204_p12  ;;  %p1214_p2 = pnand %p853_p0, %p1181_p5 }
  0x18   : > { %p37_p6 = scmp.ge.s32.totalorder %s35_s4, 2  ;;  %s1107_s6 = smov [#allocation9]  }
  0x19   : > { %p838_p4 = pnand %p837_p1, %p1177_p3  ;;  %s783_s7 = sshll.u32 %s1222_s5, 4 }
  0x1a   : > { %s155_s28 = sshll.u32 %s1374_s2, 4  ;;  %s1387_s4 = smov (%p37_p6, %s35_s4), 0  ;;  %s156_s28 = int_to_ptr.vmem [resolvable:$true] %s155_s28 }
  0x1b   : > { %840 = dma.vmem_to_smem (!%p838_p4), %s156_s28, 16, %s1107_s6, [#allocation6]  }
  0x1c   : > { %1377 = sst [smem:[#allocation16_spill]] %s1387_s4  ;;  %s39_s8 = ssub.s32 %s1101_s16, %s1387_s4 }
  0x1d   : > { %p42_p5 = scmp.eq.s32.totalorder %s39_s8, 0  ;;  %s821_s9 = sshll.u32 %s1101_s16, 4 }
  0x1e   : > { %s1378_s0 = sld [smem:[#allocation17_spill]]  ;;  %s170_s19 = scalar_lea.vmem [#allocation3], %s783_s7 }
  0x1f   : > { %s180_s22 = sshll.u32 %s170_s19, 4  ;;  %s167_s28 = scalar_lea.sflag [#allocation4], %s1222_s5  ;;  %s181_s22 = int_to_ptr.vmem [resolvable:$true] %s180_s22 }
  0x20   : > { %s1236_s26 = scalar_select %p42_p5, %s1093_s14, %s44_s20  }
  0x21   : > { %s1108_s6 = smov 128   ;;  %s1109_s2 = smov 8  }
  0x22   : > { %s201_s10 = scalar_lea.hbm %s1361_s1, %s821_s9  ;;  %s191_s19 = scalar_lea.sflag [#allocation8], %s1222_s5 }
  0x23   : > { %s202_s11 = sshll.u32 %s201_s10, 4  ;;  %216 = sbr.rel (%p1204_p12) target bundleno = 625 (0x271), region = 32  ;;  %s203_s11 = int_to_ptr.hbm [resolvable:$true] %s202_s11 }
  0x24   : > { %s177_s18 = scalar_lea.hbm %s1378_s0, %s821_s9  ;;  %s194_s0 = scalar_lea.vmem [#allocation7], %s783_s7 }
  0x25   : > { %s178_s27 = sshll.u32 %s177_s18, 4  ;;  %s204_s16 = sshll.u32 %s194_s0, 4  ;;  %s179_s27 = int_to_ptr.hbm [resolvable:$true] %s178_s27  ;;  %s205_s16 = int_to_ptr.vmem [resolvable:$true] %s204_s16 }
  0x26   : > { %844 = dma.hbm_to_vmem [thread:$0]  (!%p1214_p2), %s179_s27, 256, %s181_s22, %s167_s28, %s1108_s6, %s1108_s6, %s1109_s2  }
  0x27   : > { %847 = dma.hbm_to_vmem [thread:$0]  (!%p1214_p2), %s203_s11, 256, %s205_s16, %s191_s19, %s1108_s6, %s1108_s6, %s1109_s2  }
  0x28   : > { %s1250_s20 = sand.u32 1, %s1089_s13  }
  0x29   : > { %s790_s18 = sshll.u32 %s1250_s20, 4  ;;  %s219_s4 = scalar_lea.sflag [#allocation4], %s1250_s20 }
  0x2a   : > { %s222_s9 = scalar_lea.vmem [#allocation3], %s790_s18 }
  0x2b   : > { %1068 = dma.done.wait (%p1187_p7), %s219_s4, 256  }
  0x2c   : > { %1070 = vsyncadd (%p1187_p7), %s219_s4, 4294967040  ;;  %s229_s0 = scalar_lea.sflag [#allocation8], %s1250_s20  ;;  %s232_s2 = scalar_lea.vmem [#allocation7], %s790_s18 }
  0x2d   : > { %1072 = dma.done.wait (%p1187_p7), %s229_s0, 256  }
  0x2e   : > { %1074 = vsyncadd (%p1187_p7), %s229_s0, 4294967040 }
  0x2f   : > { %1076 = dma.done.wait (%p1177_p3), [#allocation6], 16  }
  0x30   : > { %1078 = vsyncadd (%p1177_p3), [#allocation6], 4294967280 }
  0x31   : > { %243 = sfence }
  0x32   : > { %v270_v0 = vld [vmem:[%s232_s2] sm:$0xff]  ;;  %v271_v1 = vld [vmem:[%s232_s2 + $0x8] sm:$0xff]  ;;  %s1110_s16 = smov 16   ;;  %s1111_s23 = smov 48   ;;  %v322_v14 = vlaneseq  ;;  %vm310_vm2 = vcmask 130048   ;;  %vm313_vm5 = vcmask 261120  }
  0x33   : > { %v268_v2 = vld [vmem:[%s222_s9] sm:$0xff]  ;;  %v916_v3 = vpack.i.bf16 %v270_v0, %v271_v1  ;;  %v274_v4 = vmul.f32 %v270_v0, %v270_v0  ;;  %v275_v5 = vmul.f32 %v271_v1, %v271_v1  ;;  %v269_v6 = vld [vmem:[%s222_s9 + $0x8] sm:$0xff]  ;;  %s1112_s21 = smov 32   ;;  %s1113_s29 = smov 64   ;;  %vm316_vm6 = vcmask 392192  }
  0x34   : > { %v272_v8 = vmul.f32 %v268_v2, %v268_v2  ;;  %v273_v9 = vmul.f32 %v269_v6, %v269_v6  ;;  %v276_v10 = vmul.f32 %v270_v0, %v268_v2  ;;  %v277_v11 = vmul.f32 %v271_v1, %v269_v6  ;;  %s1116_s30 = smov 80   ;;  %s1117_s5 = smov 112  }
  0x35   : > { %917 = vrot.lane.b32.xlu0 %v916_v3, %s1110_s16  ;;  %v926_v7 = vpack.i.bf16 %v274_v4, %v275_v5  ;;  %v323_v15 = vshrl.u32 %v322_v14, 7  ;;  %v326_v18 = vand.u32 127, %v322_v14  ;;  %vm319_vm9 = vcmask 523264   ;;  %s1118_s7 = smov 96   ;;  %s558_s22 = sld [smem:[#allocation9 + %s1097_s15]] }
  0x36   : > { %v921_v12 = vpack.i.bf16 %v272_v8, %v273_v9  ;;  %v931_v13 = vpack.i.bf16 %v276_v10, %v277_v11  ;;  %v1114_v40 = vmov 0.0   ;;  %v1115_v45 = vmov 1.0   ;;  %s659_s19 = scalar_lea.hbm %s1363_s3, %s1097_s15  ;;  %s265_s18 = scalar_lea.vmem [#allocation10], %s1250_s20 }
  0x37   : > { %927 = vrot.lane.b32.xlu1 %v926_v7, %s1111_s23  ;;  %v1268_v16 = vadd.s32 8, %v323_v15  ;;  %v332_v21 = vadd.s32 7, %v323_v15  ;;  %vm330_vm3 = vcmp.le.s32.totalorder %v323_v15, %v326_v18  ;;  %v384_v44 = vadd.s32 7, %v326_v18  ;;  %s661_s4 = sshll.u32 %s265_s18, 4  ;;  %s663_s9 = sshll.u32 %s659_s19, 4  ;;  %s662_s4 = int_to_ptr.vmem [resolvable:$true] %s661_s4  ;;  %s664_s9 = int_to_ptr.hbm [resolvable:$true] %s663_s9 }
  0x38   : > { %vm382_vm13 = vcmp.le.s32.totalorder %v326_v18, %v323_v15  ;;  %s651_s0 = scalar_lea.sflag [#allocation5], %s1250_s20  ;;  %s1029_s2 = sshra.s32 %s664_s9, 4  ;;  %s1030_s2 = int_to_ptr.hbm [resolvable:$true] %s1029_s2 }
  0x39   : > { %v333_v19 = vadd.s32 7, %v1268_v16  ;;  %vm331_vm0 = vcmp.le.s32.totalorder %v1268_v16, %v326_v18  ;;  %vm334_vm4 = vcmp.lt.s32.totalorder %v326_v18, %v332_v21  ;;  %vm339_vm8 = vcmp.lt.s32.totalorder %v1268_v16, 10  ;;  %s1031_s16 = scalar_lea.hbm %s1030_s2, 1  ;;  %p1036_p11 = scmp.lt.s32.totalorder %s1030_s2, %s1363_s3 }
  0x3a   : > { %vm336_vm10 = vmand %vm330_vm3, %vm334_vm4  ;;  %vm383_vm12 = vcmp.le.s32.totalorder %v326_v18, %v1268_v16  ;;  %vm386_vm14 = vcmp.lt.s32.totalorder %v1268_v16, %v384_v44  ;;  %vm385_vm15 = vcmp.lt.s32.totalorder %v323_v15, %v384_v44  ;;  %vm375_vm3 = vcmask 654336   ;;  %p1032_p3 = scmp.ne.s32.totalorder %s1030_s2, %s1031_s16 }
  0x3b   : > { %vm335_vm1 = vcmp.lt.s32.totalorder %v326_v18, %v333_v19  ;;  %v793_v41 = vsel %vm336_vm10, 1.0, %v1114_v40  ;;  %s561_s27 = smul.f32 0.03, %s558_s22 }
  0x3c   : > { %vm1272_vm7 = vmand %vm331_vm0, %vm335_vm1  ;;  %s559_s28 = smul.f32 0.01, %s558_s22  ;;  %p1033_p7 = pnand %p1032_p3, %p1191_p8 }
  0x3d   : > { %922 = vrot.lane.b32.xlu0 %v921_v12, %s1112_s21  ;;  %vm341_vm11 = vmand %vm1272_vm7, %vm339_vm8  ;;  %s562_s6 = smul.f32 %s561_s27, %s561_s27  ;;  %s1035_s21 = scalar_lea.hbm %s1363_s3, 2 }
  0x3e   : > { %v794_v42 = vsel %vm341_vm11, 1.0, %v1114_v40  ;;  %vm388_vm0 = vmand %vm383_vm12, %vm386_vm14  ;;  %s560_s8 = smul.f32 %s559_s28, %s559_s28  ;;  %vm637_vm12 = vcmask 80896   ;;  %p1034_p10 = pneg %p1033_p7 }
  0x3f   : > { %932 = vrot.lane.b32.xlu1 %v931_v13, %s1113_s29  ;;  %799 = vmatpush.msk.msra.mxu1 %vm388_vm0, %v1115_v45  ;;  %vm387_vm1 = vmand %vm382_vm13, %vm385_vm15  ;;  %v590_v10 = vstv %s562_s6  ;;  %vm648_vm13 = vcmask 73728   ;;  %p1037_p12 = scmp.lt.s32.totalorder %s1035_s21, %s1031_s16 }
  0x40   : > { %825 = vmatpush.msk.msra.mxu3 %vm388_vm0, %v1115_v45  ;;  %v1311_v12 = vstv %s560_s8 }
  0x41   : > { %800 = vmatpush.msk.msra.mxu1 %vm387_vm1, %v1115_v45  ;;  %p1038_p0 = por %p1037_p12, %p1036_p11 }
  0x42   : > { %826 = vmatpush.msk.msra.mxu3 %vm387_vm1, %v1115_v45 }
  0x43   : > { %815 = vmatpush.msk.msrb.mxu1 %vm388_vm0, %v1115_v45  ;;  %p1039_p1 = pnand %p1038_p0, %p1034_p10 }
  0x44   : > { %807 = vmatpush.msk.msrb.mxu3 %vm388_vm0, %v1115_v45 }
  0x45   : > { %816 = vmatpush.msk.msrb.mxu1 %vm387_vm1, %v1115_v45 }
  0x46   : > { %808 = vmatpush.msk.msrb.mxu3 %vm387_vm1, %v1115_v45 }
  0xa7   : > { %v918_v17 = vpop.permute.xlu0 %917 }
  0xa8   : > { %v920_v22 = vunpack.i.h.bf16 %v918_v17  ;;  %v919_v23 = vunpack.i.l.bf16 %v918_v17 }
  0xa9   : > { %v928_v20 = vpop.permute.xlu1 %927 }
  0xaa   : > { %v311_v28 = vsel %vm310_vm2, %v268_v2, %v920_v22  ;;  %v312_v29 = vsel %vm310_vm2, %v269_v6, %v919_v23  ;;  %v930_v30 = vunpack.i.h.bf16 %v928_v20  ;;  %v929_v31 = vunpack.i.l.bf16 %v928_v20 }
  0xaf   : > { %v923_v24 = vpop.permute.xlu0 %922 }
  0xb0   : > { %v925_v26 = vunpack.i.h.bf16 %v923_v24  ;;  %v924_v27 = vunpack.i.l.bf16 %v923_v24 }
  0xb1   : > { %v933_v32 = vpop.permute.xlu1 %932 }
  0xb2   : > { %v935_v33 = vunpack.i.h.bf16 %v933_v32  ;;  %v934_v34 = vunpack.i.l.bf16 %v933_v32  ;;  %v315_v35 = vsel %vm313_vm5, %v312_v29, %v924_v27  ;;  %v314_v36 = vsel %vm313_vm5, %v311_v28, %v925_v26 }
  0xb3   : > { %v318_v37 = vsel %vm316_vm6, %v315_v35, %v929_v31  ;;  %v317_v38 = vsel %vm316_vm6, %v314_v36, %v930_v30 }
  0xb4   : > { %v321_v39 = vsel %vm319_vm9, %v318_v37, %v934_v34  ;;  %v320_v43 = vsel %vm319_vm9, %v317_v38, %v935_v33 }
  0xb5   : > { %366 = vmatpush.msra.mxu0 %v321_v39  ;;  %823 = vmatpush.msra.mxu2 %v321_v39 }
  0xb7   : > { %367 = vmatpush.msra.mxu0 %v320_v43  ;;  %824 = vmatpush.msra.mxu2 %v320_v43 }
  0xb8   : > { %795 = vmatmul.msk.f32.vlgmr.msra.gmra.mxu0 %vm310_vm2, %v793_v41  ;;  %796 = vmatmul.msk.f32.vlgmr.msra.gmra.mxu2 %vm310_vm2, %v794_v42 }
  0xb9   : > { %803 = vmatpush.msk.msrb.mxu2 %vm388_vm0, %v1115_v45  ;;  %811 = vmatpush.msk.msrb.mxu0 %vm388_vm0, %v1115_v45 }
  0xbb   : > { %804 = vmatpush.msk.msrb.mxu2 %vm387_vm1, %v1115_v45  ;;  %812 = vmatpush.msk.msrb.mxu0 %vm387_vm1, %v1115_v45 }
 0x135   : > { %v369_v46 = vpop.f32.mrf.mxu0 }
 0x136   : > { %376 = vst.msk [vmem:[#allocation2] sm:$0xff] %vm375_vm3, %v369_v46 }
 0x13b   : > { %v372_v47 = vpop.f32.mrf.mxu2 }
 0x13c   : > { %377 = vst.msk [vmem:[#allocation2 + $0x8] sm:$0xff] %vm375_vm3, %v372_v47 }
 0x13d   : > { %v393_v48 = vld [vmem:[#allocation2] sm:$0xff] }
 0x13e   : > { %492 = vrot.lane.b32.xlu1 %v393_v48, %s1116_s30  ;;  %426 = vrot.lane.b32.xlu2 %v393_v48, %s1117_s5 }
 0x13f   : > { %801 = vmatmul.msk.f32.vlgmr.msra.gmra.mxu1 %vm310_vm2, %v393_v48 }
 0x143   : > { %v394_v49 = vld [vmem:[#allocation2 + $0x8] sm:$0xff] }
 0x144   : > { %428 = vrot.lane.b32.xlu0 %v394_v49, %s1117_s5  ;;  %802 = vmatmul.msk.f32.vlgmr.msra.gmra.mxu3 %vm310_vm2, %v394_v49 }
 0x146   : > { %525 = vrot.lane.b32.xlu1 %v393_v48, %s1113_s29  ;;  %459 = vrot.lane.b32.xlu2 %v393_v48, %s1118_s7 }
 0x14c   : > { %494 = vrot.lane.b32.xlu0 %v394_v49, %s1116_s30 }
 0x14e   : > { %461 = vrot.lane.b32.xlu2 %v394_v49, %s1118_s7 }
 0x156   : > { %527 = vrot.lane.b32.xlu2 %v394_v49, %s1113_s29 }
 0x198   : > { %v427_v50 = vpop.permute.xlu2 %426 }
 0x199   : > { %805 = vmatmul.msk.f32.vlgmr.msrb.gmra.mxu2 %vm310_vm2, %v427_v50 }
 0x1a0   : > { %v460_v51 = vpop.permute.xlu2 %459 }
 0x1a1   : > { %809 = vmatmul.msk.f32.vlgmr.msrb.gmra.mxu3 %vm310_vm2, %v460_v51 }
 0x1a8   : > { %v462_v52 = vpop.permute.xlu2 %461 }
 0x1a9   : > { %810 = vmatmul.msk.f32.gmra.mxu3 %vm310_vm2, %v462_v52 }
 0x1b0   : > { %v493_v53 = vpop.permute.xlu1 %492  ;;  %v528_v57 = vpop.permute.xlu2 %527 }
 0x1b1   : > { %813 = vmatmul.msk.f32.vlgmr.msrb.gmra.mxu0 %vm310_vm2, %v493_v53 }
 0x1b6   : > { %v429_v54 = vpop.permute.xlu0 %428 }
 0x1b7   : > { %806 = vmatmul.msk.f32.gmra.mxu2 %vm310_vm2, %v429_v54 }
 0x1b8   : > { %v526_v55 = vpop.permute.xlu1 %525 }
 0x1b9   : > { %817 = vmatmul.msk.f32.vlgmr.msrb.gmra.mxu1 %vm310_vm2, %v526_v55 }
 0x1bc   : > { %v418_v59 = vpop.f32.mrf.mxu1 }
 0x1bd   : > { %v424_v62 = vmul.f32 0.020408163, %v418_v59 }
 0x1be   : > { %v495_v56 = vpop.permute.xlu0 %494 }
 0x1bf   : > { %814 = vmatmul.msk.f32.gmra.mxu0 %vm310_vm2, %v495_v56  ;;  %v563_v1 = vmul.f32 %v424_v62, %v424_v62  ;;  %v581_v49 = vmul.f32 2.0, %v424_v62 }
 0x1c1   : > { %818 = vmatmul.msk.f32.gmra.mxu1 %vm310_vm2, %v528_v57 }
 0x1c7   : > { %v421_v58 = vpop.f32.mrf.mxu3 }
 0x1c8   : > { %v425_v17 = vmul.f32 0.020408163, %v421_v58 }
 0x1ca   : > { %v564_v22 = vmul.f32 %v425_v17, %v425_v17  ;;  %v582_v54 = vmul.f32 2.0, %v425_v17 }
 0x21c   : > { %v451_v60 = vpop.f32.mrf.mxu2 }
 0x21d   : > { %v1307_v63 = vmul.f32 0.020408163, %v451_v60 }
 0x21f   : > { %v569_v5 = vmul.f32 %v1307_v63, %v1307_v63  ;;  %v575_v38 = vmul.f32 %v1307_v63, %v424_v62  ;;  %v583_v57 = vmul.f32 %v581_v49, %v1307_v63 }
 0x221   : > { %v593_v9 = vadd.f32 %v569_v5, %v563_v1 }
 0x223   : > { %v595_v14 = vadd.f32 %v593_v9, %v1311_v12 }
 0x224   : > { %v484_v61 = vpop.f32.mrf.mxu3 }
 0x225   : > { %v490_v0 = vmul.f32 0.020408163, %v484_v61 }
 0x227   : > { %v565_v3 = vsub.f32 %v490_v0, %v563_v1 }
 0x229   : > { %v567_v7 = vmul.f32 1.0208334, %v565_v3 }
 0x22c   : > { %v487_v13 = vpop.f32.mrf.mxu3 }
 0x22d   : > { %v491_v20 = vmul.f32 0.020408163, %v487_v13 }
 0x22e   : > { %v517_v2 = vpop.f32.mrf.mxu0 }
 0x22f   : > { %v523_v4 = vmul.f32 0.020408163, %v517_v2  ;;  %v566_v26 = vsub.f32 %v491_v20, %v564_v22 }
 0x231   : > { %v571_v6 = vsub.f32 %v523_v4, %v569_v5  ;;  %v568_v30 = vmul.f32 1.0208334, %v566_v26  ;;  %v586_v5 = vadd.f32 %v1311_v12, %v583_v57 }
 0x233   : > { %v573_v8 = vmul.f32 1.0208334, %v571_v6 }
 0x235   : > { %v597_v11 = vadd.f32 %v573_v8, %v567_v7 }
 0x236   : > { %v550_v18 = vpop.f32.mrf.mxu1 }
 0x237   : > { %v599_v15 = vadd.f32 %v597_v11, %v590_v10  ;;  %v556_v35 = vmul.f32 0.020408163, %v550_v18 }
 0x239   : > { %v603_v19 = vmul.f32 %v599_v15, %v595_v14  ;;  %v577_v42 = vsub.f32 %v556_v35, %v575_v38 }
 0x23a   : > { %v454_v21 = vpop.f32.mrf.mxu2 }
 0x23b   : > { %936 = vrcp.f32 %v603_v19  ;;  %v458_v23 = vmul.f32 0.020408163, %v454_v21  ;;  %v579_v46 = vmul.f32 1.0208334, %v577_v42  ;;  %v616_v53 = vand.u32 2147483648, %v603_v19 }
 0x23c   : > { %v520_v24 = vpop.f32.mrf.mxu0  ;;  %vm610_vm4 = vweird.f32 %v603_v19  ;;  %v614_v58 = vand.u32 2147483647, %v603_v19 }
 0x23d   : > { %v524_v25 = vmul.f32 0.020408163, %v520_v24  ;;  %v570_v27 = vmul.f32 %v458_v23, %v458_v23  ;;  %v576_v41 = vmul.f32 %v458_v23, %v425_v17  ;;  %v588_v51 = vmul.f32 2.0, %v579_v46 }
 0x23e   : > { %v553_v33 = vpop.f32.mrf.mxu1  ;;  %v584_v59 = vmul.f32 %v582_v54, %v458_v23  ;;  %v617_v1 = vor.u32 1.1754944e-38, %v616_v53  ;;  %vm615_vm7 = vcmp.eq.f32.partialorder %v614_v58, 8.507059e+37 }
 0x23f   : > { %v572_v28 = vsub.f32 %v524_v25, %v570_v27  ;;  %v594_v32 = vadd.f32 %v570_v27, %v564_v22  ;;  %v557_v37 = vmul.f32 0.020408163, %v553_v33  ;;  %v591_v61 = vadd.f32 %v590_v10, %v588_v51 }
 0x240   : > { %v587_v7 = vadd.f32 %v1311_v12, %v584_v59 }
 0x241   : > { %v937_v29 = vpop.eup %936  ;;  %v574_v31 = vmul.f32 1.0208334, %v572_v28  ;;  %v596_v39 = vadd.f32 %v594_v32, %v1311_v12  ;;  %v578_v45 = vsub.f32 %v557_v37, %v576_v41  ;;  %v601_v8 = vmul.f32 %v591_v61, %v586_v5 }
 0x242   : > { %v606_v34 = vmul.f32 %v937_v29, %v603_v19  ;;  %vm611_vm2 = vweird.f32 %v937_v29 }
 0x243   : > { %v598_v36 = vadd.f32 %v574_v31, %v568_v30  ;;  %v580_v48 = vmul.f32 1.0208334, %v578_v45  ;;  %vm612_vm5 = vmor %vm610_vm4, %vm611_vm2 }
 0x244   : > { %v607_v43 = vsub.f32 1.0, %v606_v34 }
 0x245   : > { %v600_v40 = vadd.f32 %v598_v36, %v590_v10  ;;  %v589_v56 = vmul.f32 2.0, %v580_v48 }
 0x246   : > { %v608_v47 = vmul.f32 %v937_v29, %v607_v43 }
 0x247   : > { %v604_v44 = vmul.f32 %v600_v40, %v596_v39  ;;  %v592_v62 = vadd.f32 %v590_v10, %v589_v56 }
 0x248   : > { %v609_v52 = vadd.f32 %v937_v29, %v608_v47 }
 0x249   : > { %938 = vrcp.f32 %v604_v44  ;;  %v631_v2 = vand.u32 2147483648, %v604_v44  ;;  %v629_v4 = vand.u32 2147483647, %v604_v44  ;;  %vm625_vm9 = vweird.f32 %v604_v44 }
 0x24a   : > { %v613_v0 = vsel %vm612_vm5, %v937_v29, %v609_v52  ;;  %v602_v11 = vmul.f32 %v592_v62, %v587_v7 }
 0x24b   : > { %v618_v6 = vsel %vm615_vm7, %v617_v1, %v613_v0  ;;  %v632_v9 = vor.u32 1.1754944e-38, %v631_v2  ;;  %vm630_vm11 = vcmp.eq.f32.partialorder %v629_v4, 8.507059e+37 }
 0x24c   : > { %v619_v10 = vmul.f32 %v618_v6, %v601_v8 }
 0x24e   : > { %v638_v18 = vsel %vm637_vm12, %v619_v10, 0.0 }
 0x24f   : > { %v939_v50 = vpop.eup %938 }
 0x250   : > { %v621_v55 = vmul.f32 %v939_v50, %v604_v44  ;;  %vm626_vm6 = vweird.f32 %v939_v50 }
 0x251   : > { %vm627_vm10 = vmor %vm625_vm9, %vm626_vm6 }
 0x252   : > { %v622_v60 = vsub.f32 1.0, %v621_v55 }
 0x254   : > { %v623_v3 = vmul.f32 %v939_v50, %v622_v60 }
 0x256   : > { %v624_v63 = vadd.f32 %v939_v50, %v623_v3 }
 0x258   : > { %v628_v13 = vsel %vm627_vm10, %v939_v50, %v624_v63 }
 0x259   : > { %v633_v14 = vsel %vm630_vm11, %v632_v9, %v628_v13 }
 0x25a   : > { %v634_v15 = vmul.f32 %v633_v14, %v602_v11 }
 0x25c   : > { %v636_v17 = vsel %vm339_vm8, %v634_v15, 0.0 }
 0x25d   : > { %v639_v19 = vsel %vm637_vm12, %v636_v17, 0.0 }
 0x25e   : > { %v640_v12 = vadd.f32 %v639_v19, %v638_v18 }
 0x260   : > { %v641_v20 = vrot.slane %v640_v12, 4 }
 0x262   : > { %v642_v21 = vadd.f32 %v641_v20, %v640_v12 }
 0x264   : > { %v643_v22 = vrot.slane %v642_v21, 2 }
 0x266   : > { %v644_v23 = vadd.f32 %v643_v22, %v642_v21 }
 0x268   : > { %v645_v24 = vrot.slane %v644_v23, 1 }
 0x26a   : > { %v646_v25 = vadd.f32 %v645_v24, %v644_v23 }
 0x26c   : > { %v647_v16 = vmul.f32 0.1, %v646_v25 }
 0x26e   : > { %649 = vst.msk [vmem:[%s265_s18] sm:$0x1] %vm648_vm13, %v647_v16 }
 0x26f   : > { %1042 = shalt.err (!%p1039_p1)
}
 0x270   : > { %835 = dma.vmem_to_hbm [thread:$0]  (%p1191_p8), %s662_s4, 16, %s664_s9, %s651_s0  }
 0x271 PF: > { %s675_s20 = sand.u32 1, %s1085_s12   ;;  %p849_p2 = pnand %p782_p13, %p1195_p9 }
 0x272   : > { %s676_s5 = scalar_lea.sflag [#allocation5], %s675_s20 }
 0x273   : > { %p850_p4 = pneg %p849_p2 }
 0x275   : > { %1080 = dma.done.wait (%p850_p4), %s676_s5, 16  }
 0x276   : > { %1082 = vsyncadd (%p850_p4), %s676_s5, 4294967280  ;;  %s23_s17 = sadd.s32 1, %s1105_s17   ;;  %s1381_s15 = sld [smem:[#allocation15_spill]] }
 0x277   : > { %p20_p6 = scmp.ge.s32.totalorder %s23_s17, 4   ;;  %s1382_s16 = sld [smem:[#allocation16_spill]] }
 0x278   : > { %s1383_s12 = smov %s1089_s13  ;;  %s1384_s13 = smov %s1093_s14 }
 0x279   : > { %s1385_s14 = smov %s1236_s26  ;;  %22 = sbr.rel (!%p20_p6) target bundleno = 12 (0xc), region = 99 }
 0x27e   :  { %681 = vsyncpa [#allocation4], 1 }
 0x27f   :  { %683 = vsyncpa [#allocation4 + $0x1], 1 }
 0x280   :  { %684 = vsyncpa [#allocation8], 1 }
 0x281   :  { %686 = vsyncpa [#allocation8 + $0x1], 1 }
 0x282   :  { %687 = vsyncpa [#allocation5], 1 }
 0x283   :  { %689 = vsyncpa [#allocation5 + $0x1], 1 }
 0x284   :  { %690 = vsyncpa [#allocation6], 1 }
 0x285   :  { %692 = vsyncpa [#allocation6 + $0x1], 1 }

</bundles_post_ra>
